<compile_context>
chip_gen: v7x
topology: tpu7x:2x2x1
jax: 0.10.0
libtpu: 0.0.40
codegen_flags: <defaults>
</compile_context>

<pallas_src>
import functools

import jax
import jax.numpy as jnp
from jax.experimental import pallas as pl
from jax.experimental.pallas import tpu as pltpu


def _adain_kernel(x_ref, w_ref, b_ref, o_ref, *, eps, inv_hw, row_tile):
    # x_ref : (row_tile, HW)  block of the (B*C, H*W) slab
    # w_ref : (BCp, 1)        full, VMEM-resident affine scale
    # b_ref : (BCp, 1)        full, VMEM-resident affine shift
    # o_ref : (row_tile, HW)  output block
    x = x_ref[...].astype(jnp.float32)

    # Slice this step's rows out of the resident weight/bias arrays (avoids a
    # per-step 32-byte DMA whose descriptor cost dwarfs its payload).
    start = pl.multiple_of(pl.program_id(0) * row_tile, row_tile)
    w = w_ref[pl.ds(start, row_tile), :]
    b = b_ref[pl.ds(start, row_tile), :]

    # Per-row (per-instance) biased statistics, matching F.batch_norm with
    # training=True on a (1, B*C, H, W) view.  The two-pass variance is kept
    # on purpose: E[x^2] - mean^2 cancels badly for large DC offsets, and this
    # kernel is HBM-bandwidth bound so the extra VPU/XLU pass is free.
    mean = jnp.sum(x, axis=-1, keepdims=True) * inv_hw
    xc = x - mean
    var = jnp.sum(xc * xc, axis=-1, keepdims=True) * inv_hw

    scale = jax.lax.rsqrt(var + eps) * w          # (row_tile, 1)
    o_ref[...] = (xc * scale + b).astype(o_ref.dtype)


def _vmem_capacity_bytes():
    """Physical VMEM per TensorCore (v5e/v6e: 128 MiB, v7x: 64 MiB)."""
    try:
        cap = getattr(pltpu.get_tpu_info(), "vmem_capacity_bytes", None)
        if cap:
            return int(cap)
    except Exception:
        pass
    return 64 << 20  # conservative default (v7x per-TensorCore VMEM)


def _pick_row_tile(bc, hw, itemsize, block_budget_bytes, sublane):
    """Rows per block: big enough to hit HBM roofline, small enough for VMEM."""
    # VMEM per block row: double-buffered input + output blocks plus ~3
    # f32-sized temporaries (upcast x, centered x, pre-downcast result).
    per_row = hw * (4 * itemsize + 3 * 4)
    max_rows_vmem = max(sublane, block_budget_bytes // per_row)
    # ~4-8 MiB of raw input per block keeps the ~0.35 us/step overhead
    # negligible (measured >=85% of HBM roofline regime on v6e).
    target_rows = max(sublane, (8 << 20) // (hw * itemsize))
    desired = min(bc, max_rows_vmem, target_rows)
    # Keep a few grid steps alive when bc allows it so the double-buffered DMA
    # pipeline (and v7x's two TensorCores on the "parallel" axis) have work to
    # overlap -- but don't shrink blocks below ~2 MiB to do so.
    if bc // desired < 8:
        alt = bc // 8
        if alt >= sublane and alt * hw * itemsize >= (2 << 20):
            desired = min(desired, alt)
    desired = max(desired, sublane)
    # row_tile must divide bc (bc is a multiple of sublane by construction)
    # and be a sublane multiple so the (8, 128) tiling constraint holds.
    for rt in range(desired, sublane - 1, -1):
        if bc % rt == 0 and rt % sublane == 0:
            return rt
    return sublane


def adaptive_instance_norm_2d(x, weight, bias, *, eps=1e-5, row_tile=None):
    """AdaIN forward.  x: (B, C, H, W); weight, bias: (B*C,). Returns (B, C, H, W).

    # TODO(synk): running_mean / running_var momentum update (training-time
    # buffer side effect only, does not affect the returned tensor) is not
    # emitted.
    """
    B, C, H, W = x.shape
    BC, HW = B * C, H * W
    itemsize = jnp.dtype(x.dtype).itemsize
    # Sublane packing: 8 rows/vreg for 4-byte dtypes, 16 for bf16, 32 for int8.
    sublane = max(8, 32 // max(1, itemsize))

    x2d = x.reshape(BC, HW)
    w2d = weight.reshape(BC, 1).astype(jnp.float32)
    b2d = bias.reshape(BC, 1).astype(jnp.float32)

    # Pad the instance axis up to the sublane packing so every row block is a
    # legal (multiple-of-sublane, full-HW) tile; padded rows are sliced off.
    pad = (-BC) % sublane
    if pad:
        x2d = jnp.pad(x2d, ((0, pad), (0, 0)))
        w2d = jnp.pad(w2d, ((0, pad), (0, 0)))
        b2d = jnp.pad(b2d, ((0, pad), (0, 0)))
    BCp = BC + pad

    # Generation-aware VMEM budgeting.
    vmem_cap = _vmem_capacity_bytes()
    vmem_limit = min(int(vmem_cap * 0.75), 96 << 20)
    block_budget = int(vmem_limit * 0.6)  # headroom for compiler scratch etc.

    if row_tile is None:
        row_tile = _pick_row_tile(BCp, HW, itemsize, block_budget, sublane)
    assert BCp % row_tile == 0 and row_tile % sublane == 0
    # TODO(synk): for very large HW (a single sublane-worth of rows exceeding
    # the VMEM budget) a two-pass HW-split grid with sum/sumsq scratch
    # accumulators would be needed; not emitted here.

    grid = (BCp // row_tile,)

    cost = pl.CostEstimate(
        flops=8 * BCp * HW,
        transcendentals=BCp,
        bytes_accessed=2 * BCp * HW * itemsize + 2 * BCp * 4,
    )

    out2d = pl.pallas_call(
        functools.partial(
            _adain_kernel, eps=float(eps), inv_hw=1.0 / HW, row_tile=row_tile
        ),
        out_shape=jax.ShapeDtypeStruct((BCp, HW), x.dtype),
        grid_spec=pltpu.PrefetchScalarGridSpec(
            num_scalar_prefetch=0,
            grid=grid,
            in_specs=[
                pl.BlockSpec((row_tile, HW), lambda i: (i, 0)),
                # weight / bias: full array, constant index map -> fetched once
                # and kept VMEM-resident across the whole grid.
                pl.BlockSpec((BCp, 1), lambda i: (0, 0)),
                pl.BlockSpec((BCp, 1), lambda i: (0, 0)),
            ],
            out_specs=pl.BlockSpec((row_tile, HW), lambda i: (i, 0)),
        ),
        compiler_params=pltpu.CompilerParams(
            dimension_semantics=("parallel",),
            vmem_limit_bytes=vmem_limit,
        ),
        cost_estimate=cost,
    )(x2d, w2d, b2d)

    if pad:
        out2d = out2d[:BC]
    return out2d.reshape(B, C, H, W)


def _reference(x, weight, bias, eps=1e-5):
    B, C, H, W = x.shape
    x2d = x.reshape(B * C, H * W).astype(jnp.float32)
    mean = jnp.mean(x2d, axis=-1, keepdims=True)
    var = jnp.mean((x2d - mean) ** 2, axis=-1, keepdims=True)
    y = (x2d - mean) / jnp.sqrt(var + eps)
    y = y * weight.reshape(-1, 1) + bias.reshape(-1, 1)
    return y.reshape(B, C, H, W).astype(x.dtype)


if __name__ == "__main__":
    B, C, H, W = 2, 4, 16, 16  # num_features = C = 4
    key = jax.random.PRNGKey(0)
    kx, kw, kb = jax.random.split(key, 3)

    x = jax.random.normal(kx, (B, C, H, W), dtype=jnp.float32)
    # AdaIN weight/bias are assigned externally with shape (B*C,);
    # initialize them deterministically here.
    weight = 1.0 + 0.1 * jax.random.normal(kw, (B * C,), dtype=jnp.float32)
    bias = 0.1 * jax.random.normal(kb, (B * C,), dtype=jnp.float32)

    out = adaptive_instance_norm_2d(x, weight, bias)
    out = jax.block_until_ready(out)

    ref = _reference(x, weight, bias)
    assert jnp.allclose(out, ref, atol=1e-4, rtol=1e-4), "mismatch vs reference"

    print("KERNEL_OK")
</pallas_src>

<mosaic_0001>
module attributes {stable_mosaic.version = 11 : i64} {
  func.func @_adain_kernel(%arg0: i32, %arg1: memref<8x256xf32, #tpu.memory_space<vmem>>, %arg2: memref<8x1xf32, #tpu.memory_space<vmem>>, %arg3: memref<8x1xf32, #tpu.memory_space<vmem>>, %arg4: memref<8x256xf32, #tpu.memory_space<vmem>>) attributes {dimension_semantics = [#tpu.dimension_semantics<parallel>], iteration_bounds = array<i64: 1>, scalar_prefetch = 0 : i64, scratch_operands = 0 : i64, tpu.core_type = #tpu.core_type<tc>, window_params = [{transform_indices = @transform_0, window_bounds = array<i64: 8, 256>}, {pipeline_mode = #tpu.pipeline_mode<synchronous>, transform_indices = @transform_1, window_bounds = array<i64: 8, 1>}, {pipeline_mode = #tpu.pipeline_mode<synchronous>, transform_indices = @transform_2, window_bounds = array<i64: 8, 1>}, {transform_indices = @transform_3, window_bounds = array<i64: 8, 256>}]} {
    %c0 = arith.constant 0 : index
    %c0_0 = arith.constant 0 : index
    %0 = vector.load %arg1[%c0, %c0_0] : memref<8x256xf32, #tpu.memory_space<vmem>>, vector<8x256xf32>
    %c8_i32 = arith.constant 8 : i32
    %1 = arith.muli %arg0, %c8_i32 : i32
    %2 = tpu.assume_multiple %1, 8 : i32
    %3 = arith.index_cast %2 : i32 to index
    %c0_1 = arith.constant 0 : index
    %4 = vector.load %arg2[%3, %c0_1] : memref<8x1xf32, #tpu.memory_space<vmem>>, vector<8x1xf32>
    %5 = arith.index_cast %2 : i32 to index
    %c0_2 = arith.constant 0 : index
    %6 = vector.load %arg3[%5, %c0_2] : memref<8x1xf32, #tpu.memory_space<vmem>>, vector<8x1xf32>
    %cst = arith.constant dense<0.000000e+00> : vector<8xf32>
    %7 = vector.multi_reduction <add>, %0, %cst [1] : vector<8x256xf32> to vector<8xf32>
    %8 = vector.shape_cast %7 : vector<8xf32> to vector<8x1xf32>
    %cst_3 = arith.constant 3.906250e-03 : f32
    %9 = vector.broadcast %cst_3 : f32 to vector<8x1xf32>
    %10 = arith.mulf %8, %9 : vector<8x1xf32>
    %11 = vector.broadcast %10 : vector<8x1xf32> to vector<8x256xf32>
    %12 = arith.subf %0, %11 : vector<8x256xf32>
    %13 = arith.mulf %12, %12 : vector<8x256xf32>
    %cst_4 = arith.constant dense<0.000000e+00> : vector<8xf32>
    %14 = vector.multi_reduction <add>, %13, %cst_4 [1] : vector<8x256xf32> to vector<8xf32>
    %15 = vector.shape_cast %14 : vector<8xf32> to vector<8x1xf32>
    %cst_5 = arith.constant 3.906250e-03 : f32
    %16 = vector.broadcast %cst_5 : f32 to vector<8x1xf32>
    %17 = arith.mulf %15, %16 : vector<8x1xf32>
    %cst_6 = arith.constant 9.99999974E-6 : f32
    %18 = vector.broadcast %cst_6 : f32 to vector<8x1xf32>
    %19 = arith.addf %17, %18 : vector<8x1xf32>
    %20 = math.rsqrt %19 : vector<8x1xf32>
    %21 = arith.mulf %20, %4 : vector<8x1xf32>
    %22 = vector.broadcast %21 : vector<8x1xf32> to vector<8x256xf32>
    %23 = arith.mulf %12, %22 : vector<8x256xf32>
    %24 = vector.broadcast %6 : vector<8x1xf32> to vector<8x256xf32>
    %25 = arith.addf %23, %24 : vector<8x256xf32>
    %c0_7 = arith.constant 0 : index
    %c0_8 = arith.constant 0 : index
    %26 = vector.load %arg4[%c0_7, %c0_8] : memref<8x256xf32, #tpu.memory_space<vmem>>, vector<8x256xf32>
    tpu.vector_store %arg4[%c0_7, %c0_8], %25 {strides = array<i32>} : memref<8x256xf32, #tpu.memory_space<vmem>>, vector<8x256xf32>,
    return
  }
  func.func @transform_0(%arg0: i32) -> (i32, i32) {
    %c0_i32 = arith.constant 0 : i32
    %c0_i32_0 = arith.constant 0 : i32
    return %arg0, %c0_i32 : i32, i32
  }
  func.func @transform_1(%arg0: i32) -> (i32, i32) {
    %c0_i32 = arith.constant 0 : i32
    %c0_i32_0 = arith.constant 0 : i32
    %c0_i32_1 = arith.constant 0 : i32
    return %c0_i32, %c0_i32_0 : i32, i32
  }
  func.func @transform_2(%arg0: i32) -> (i32, i32) {
    %c0_i32 = arith.constant 0 : i32
    %c0_i32_0 = arith.constant 0 : i32
    %c0_i32_1 = arith.constant 0 : i32
    return %c0_i32, %c0_i32_0 : i32, i32
  }
  func.func @transform_3(%arg0: i32) -> (i32, i32) {
    %c0_i32 = arith.constant 0 : i32
    %c0_i32_0 = arith.constant 0 : i32
    return %arg0, %c0_i32 : i32, i32
  }
}

</mosaic_0001>

<bundles_post_ra>
// kernel: tpu_custom_call.1
= control target key start
LH: loop header
LB: loop body
LE: loop exit
PB: predicated region body
PF: predicated region fallthrough
CT: control target
= control target key end

     0   :  { %s143_s0 = inlined_call_operand.vmem [shape: f32[8,256], index: 0, kind: input, shape index: {}]   ;;  %s144_s1 = inlined_call_operand.vmem [shape: f32[8,1], index: 1, kind: input, shape index: {}]   ;;  %s145_s2 = inlined_call_operand.vmem [shape: f32[8,1], index: 2, kind: input, shape index: {}]   ;;  %s146_s3 = inlined_call_operand.hbm [shape: f32[8,256], index: 3, kind: output, shape index: {}]  }
   0x1   :  { %v15_v0 = vld [vmem:[%s143_s0] sm:$0xff]  ;;  %v16_v1 = vld [vmem:[%s143_s0 + $0x8] sm:$0xff] }
   0x2   :  { %8 = vsyncpa [#allocation3], 0  ;;  %v22_v2 = vadd.f32 %v16_v1, %v15_v0  ;;  %v97_v10 = vmov 0   ;;  %v19_v14 = vld [vmem:[%s144_s1] sm:$0xff]  ;;  %s98_s19 = smov [#allocation2]  }
   0x3   :  { %69 = vset.pattern.permute.xlu1 %v97_v10  ;;  %70 = vset.pattern.permute.xlu0 %v97_v10  ;;  %v21_v17 = vld [vmem:[%s145_s2] sm:$0xff]  ;;  %s59_s20 = sshll.u32 %s98_s19, 4  ;;  %s60_s20 = int_to_ptr.vmem [resolvable:$true] %s59_s20 }
   0x4   :  { %23 = vadd.xlane.f32.xlu0 %v22_v2  ;;  %s73_s1 = scalar_lea.vmem %s60_s20, 256  ;;  %p78_p1 = scmp.lt.s32.totalorder %s60_s20, %s60_s20 }
   0x5   :  { %p74_p0 = scmp.ne.s32.totalorder %s60_s20, %s73_s1  ;;  %p79_p2 = scmp.lt.s32.totalorder %s73_s1, %s73_s1 }
   0x7   :  { %p80_p3 = por %p79_p2, %p78_p1 }
   0x9   :  { %p81_p4 = pnand %p80_p3, %p74_p0 }
  0x91   :  { %v24_v3 = vpop.xlane.xlu0 %23 }
  0x92   :  { %v25_v4 = vmul.f32 0.00390625, %v24_v3 }
  0x94   :  { %v26_v5 = vsub.f32 %v15_v0, %v25_v4  ;;  %v27_v6 = vsub.f32 %v16_v1, %v25_v4 }
  0x96   :  { %v28_v7 = vmul.f32 %v26_v5, %v26_v5  ;;  %v29_v8 = vmul.f32 %v27_v6, %v27_v6 }
  0x98   :  { %v30_v9 = vadd.f32 %v29_v8, %v28_v7 }
  0x9a   :  { %31 = vadd.xlane.f32.xlu0 %v30_v9 }
 0x127   :  { %v32_v11 = vpop.xlane.xlu0 %31 }
 0x128   :  { %v33_v12 = vmul.f32 0.00390625, %v32_v11 }
 0x12a   :  { %v34_v13 = vadd.f32 1e-05, %v33_v12 }
 0x12c   :  { %71 = vrsqrt.f32 %v34_v13 }
 0x136   :  { %v72_v15 = vpop.eup %71 }
 0x137   :  { %v36_v16 = vmul.f32 %v72_v15, %v19_v14 }
 0x139   :  { %39 = vperm.xlu1 %69, %v36_v16  }
 0x13d   :  { %46 = vperm.xlu1 %69, %v21_v17  }
 0x1b8   :  { %v40_v18 = vpop.permute.xlu1 %39 }
 0x1b9   :  { %v42_v19 = vmul.f32 %v40_v18, %v26_v5  ;;  %v43_v20 = vmul.f32 %v40_v18, %v27_v6 }
 0x1bc   :  { %v47_v21 = vpop.permute.xlu1 %46 }
 0x1bd   :  { %v49_v22 = vadd.f32 %v47_v21, %v42_v19  ;;  %v50_v23 = vadd.f32 %v47_v21, %v43_v20 }
 0x1bf   :  { %51 = vst [vmem:[#allocation2] sm:$0xff] %v49_v22  ;;  %52 = vst [vmem:[#allocation2 + $0x8] sm:$0xff] %v50_v23 }
 0x1c0   :  { %84 = shalt.err (!%p81_p4)
}
 0x1c1   :  { %s85_s22 = scalar_lea.hbm %s146_s3, 256 }
 0x1c2   :  { %p86_p5 = scmp.ne.s32.totalorder %s146_s3, %s85_s22  ;;  %p89_p6 = scmp.lt.u32.totalorder %s85_s22, %s146_s3 }
 0x1c4   :  { %p91_p7 = pnand %p89_p6, %p86_p5 }
 0x1c6   :  { %94 = shalt.err (!%p91_p7)
}
 0x1c7   :  { %62 = dma.vmem_to_hbm [thread:$0]  %s60_s20, 256, %s146_s3, [#allocation3]  }
 0x1c8   :  { %95 = dma.done.wait [#allocation3], 256  }
 0x1c9   :  { %96 = vsyncadd [#allocation3], 4294967040 }
 0x1ca   :  { %66 = vsyncpa [#allocation3], 1 }

</bundles_post_ra>
